<compile_context>
chip_gen: v6e
topology: v6e:2x2x1
jax: 0.10.0
libtpu: 0.0.40
codegen_flags: <defaults>
</compile_context>

<pallas_src>
import numpy as np
import jax
import jax.numpy as jnp
from jax.experimental import pallas as pl
from jax.experimental.pallas import tpu as pltpu

BN_EPS = 1e-5


def _tcn_gcn_kernel(x_ref, g_ref, bg_ref, wt_ref, bt_ref, o_ref, yp_scr):
    """Fused unit_gcn -> temporal zero-pad -> unit_tcn -> residual -> ReLU.

    x_ref : (NB, T, C*V)      f32   input batch-block, lane-dense last dim
    g_ref : (C*V, Cout*V)     bf16  fused GCN operator (BN folded)
    bg_ref: (1, Cout*V)       f32   fused GCN bias (conv biases + BN shift)
    wt_ref: (K, C*V, Cout*V)  bf16  fused TCN operator, one (CV,OV) matrix per tap
    bt_ref: (1, Cout*V)       f32   fused TCN bias (conv bias + BN shift)
    o_ref : (NB, T, Cout*V)   f32   output batch-block
    yp_scr: (NB, T+K-1, C*V)  bf16  VMEM scratch: temporally zero-padded GCN output
    """
    NB, T, CV = x_ref.shape
    OV = o_ref.shape[2]
    K = wt_ref.shape[0]
    pad = (K - 1) // 2

    # ---- unit_gcn: ONE MXU matmul over the fused (subset x channel x vertex) operator.
    xr = x_ref[...].reshape(NB * T, CV)                                  # f32
    z = jnp.dot(xr.astype(jnp.bfloat16), g_ref[...],
                preferred_element_type=jnp.float32)                      # (NB*T, OV)
    y = jnp.maximum(z + bg_ref[...] + xr, 0.0)   # eval-BN folded; identity down; ReLU
    # (xr / z are not used after this point -> nothing f32-wide is carried across the TCN)

    # ---- temporal zero-padding kept in VMEM as bf16; only the halo rows are zeroed ----
    yp_scr[:, :pad, :] = jnp.zeros((NB, pad, CV), jnp.bfloat16)
    yp_scr[:, pad + T:, :] = jnp.zeros((NB, pad, CV), jnp.bfloat16)
    yp_scr[:, pad:pad + T, :] = y.astype(jnp.bfloat16).reshape(NB, T, CV)

    # ---- unit_tcn: K accumulated dots straight from the bf16 scratch (no staging concat)
    acc = jnp.dot(yp_scr[:, 0:T, :].reshape(NB * T, CV), wt_ref[0],
                  preferred_element_type=jnp.float32)
    for k in range(1, K):
        acc = acc + jnp.dot(yp_scr[:, k:k + T, :].reshape(NB * T, CV), wt_ref[k],
                            preferred_element_type=jnp.float32)

    # ---- epilogue: TCN bias/BN + outer identity residual (x re-read from VMEM) + ReLU
    out = acc + bt_ref[...] + x_ref[...].reshape(NB * T, OV)
    o_ref[...] = jnp.maximum(out, 0.0).reshape(NB, T, OV)


def _choose_batch_block(N, T, CV, OV, K, vmem_budget_bytes):
    """Pick batch elements per grid step: pipeline the x/out DMAs (several grid steps,
    megacore-friendly), keep nb*T reasonably tall for MXU weight-load amortization,
    and stay inside the per-step VMEM residency budget."""
    per_elem = (2 * T * CV * 4            # x double-buffer (f32)
                + 2 * T * OV * 4          # out double-buffer (f32)
                + (T + K - 1) * CV * 2    # bf16 padded scratch
                + 4 * T * OV * 4)         # live f32 intermediates (z / y / acc headroom)
    weight_bytes = 2 * ((K + 1) * CV * OV * 2 + 2 * OV * 4)   # double-buffered operators
    nb_vmem = max(1, int((vmem_budget_bytes - weight_bytes) // per_elem))
    nb_mxu = max(1, -(-512 // T))                   # target nb*T >= ~512
    nb = max(1, min(nb_vmem, nb_mxu, N))
    nb = min(nb, max(1, N // min(8, N)))            # keep >= min(8, N) grid steps
    while N % nb:                                    # grid must tile the batch exactly
        nb -= 1
    return nb


def fuse_tcn_gcn_params(pa, w_gcn, b_gcn, w_tcn, b_tcn, bn_gcn, bn_tcn):
    """Fold adaptive-adjacency L2 norm, S 1x1 convs, K temporal taps and both
    eval-mode BatchNorms into two matmul operators + two bias rows.

    bn_* = (gamma, beta, running_mean, running_var), each shape (Cout,).
    """
    S, Cout, Cin = w_gcn.shape
    V = pa.shape[-1]
    K = w_tcn.shape[2]
    CV, OV = Cin * V, Cout * V

    # adaptive adjacency: A / (||A||_2 over dim=1 + 1e-4)
    a_n = pa / (jnp.sqrt(jnp.sum(pa * pa, axis=1, keepdims=True)) + 1e-4)

    g_g, b_g, m_g, v_g = [jnp.asarray(t, jnp.float32) for t in bn_gcn]
    g_t, b_t, m_t, v_t = [jnp.asarray(t, jnp.float32) for t in bn_tcn]
    s_g = g_g / jnp.sqrt(v_g + BN_EPS)              # per-channel GCN BN scale
    s_t = g_t / jnp.sqrt(v_t + BN_EPS)              # per-channel TCN BN scale

    # fused GCN operator: G[c*V+v, o*V+w] = s_g[o] * sum_i W_i[o,c] * A_i[v,w]
    g4 = jnp.einsum('ioc,ivw->cvow', w_gcn.astype(jnp.float32), a_n)
    g_mat = (g4 * s_g[None, None, :, None]).reshape(CV, OV).astype(jnp.bfloat16)
    bg = s_g * jnp.sum(b_gcn, axis=0) + (b_g - m_g * s_g)
    bg_row = (bg[:, None] * jnp.ones((1, V), jnp.float32)).reshape(1, OV)

    # fused TCN operator: Wt[k, c*V+w', o*V+w] = s_t[o] * W_tcn[o,c,k] * delta(w', w)
    eye_v = jnp.eye(V, dtype=jnp.float32)
    wt5 = jnp.einsum('ock,uv->kcuov', w_tcn.astype(jnp.float32), eye_v)
    wt_stack = (wt5 * s_t[None, None, None, :, None]).reshape(K, CV, OV).astype(jnp.bfloat16)
    bt = s_t * b_tcn + (b_t - m_t * s_t)
    bt_row = (bt[:, None] * jnp.ones((1, V), jnp.float32)).reshape(1, OV)
    return g_mat, bg_row, wt_stack, bt_row


def tcn_gcn_unit_apply_flat(x_flat, g_mat, bg_row, wt_stack, bt_row, *,
                            batch_block=None, vmem_limit_bytes=32 * 1024 * 1024):
    """Run the fused unit on channels-last-flat activations (N, T, C*V).

    Stacked TCN_GCN units should call this directly and keep the flat layout across
    layers (convert from/to (N, C, T, V) once at the model boundary)."""
    N, T, CV = x_flat.shape
    K, _, OV = wt_stack.shape
    assert CV == OV, "TODO(synk): Cin != Cout (non-identity down/residual) not implemented"

    nb = (_choose_batch_block(N, T, CV, OV, K, int(0.75 * vmem_limit_bytes))
          if batch_block is None else batch_block)
    assert N % nb == 0

    return pl.pallas_call(
        _tcn_gcn_kernel,
        out_shape=jax.ShapeDtypeStruct((N, T, OV), jnp.float32),
        grid_spec=pltpu.PrefetchScalarGridSpec(
            num_scalar_prefetch=0,
            grid=(N // nb,),
            in_specs=[
                pl.BlockSpec((nb, T, CV), lambda b: (b, 0, 0)),
                pl.BlockSpec((CV, OV), lambda b: (0, 0)),
                pl.BlockSpec((1, OV), lambda b: (0, 0)),
                pl.BlockSpec((K, CV, OV), lambda b: (0, 0, 0)),
                pl.BlockSpec((1, OV), lambda b: (0, 0)),
            ],
            out_specs=pl.BlockSpec((nb, T, OV), lambda b: (b, 0, 0)),
            scratch_shapes=[pltpu.VMEM((nb, T + K - 1, CV), jnp.bfloat16)],
        ),
        compiler_params=pltpu.CompilerParams(
            dimension_semantics=("parallel",),
            vmem_limit_bytes=vmem_limit_bytes),
    )(x_flat, g_mat, bg_row, wt_stack, bt_row)


def tcn_gcn_unit_forward(x, pa, w_gcn, b_gcn, w_tcn, b_tcn, bn_gcn=None, bn_tcn=None,
                         *, batch_block=None):
    """TCN_GCN_unit.forward for in_channels == out_channels, stride=1, residual=True.

    Standalone entry point in the PyTorch (N, C, T, V) layout. The two transposes here
    are per-unit relayout cost; a stacked model should use tcn_gcn_unit_apply_flat.
    """
    N, C, T, V = x.shape
    S, Cout, Cin = w_gcn.shape
    K = w_tcn.shape[2]
    assert Cin == C and Cout == C, "implements the in_channels == out_channels config"
    assert K % 2 == 1, "even temporal kernel size would need asymmetric padding"

    if bn_gcn is None:   # module init: bn_init(self.bn, 1e-6), running stats (0, 1)
        bn_gcn = (jnp.full((Cout,), 1e-6, jnp.float32), jnp.zeros((Cout,), jnp.float32),
                  jnp.zeros((Cout,), jnp.float32), jnp.ones((Cout,), jnp.float32))
    if bn_tcn is None:   # module init: bn_init(self.bn, 1), running stats (0, 1)
        bn_tcn = (jnp.ones((Cout,), jnp.float32), jnp.zeros((Cout,), jnp.float32),
                  jnp.zeros((Cout,), jnp.float32), jnp.ones((Cout,), jnp.float32))

    fused = fuse_tcn_gcn_params(pa, w_gcn, b_gcn, w_tcn, b_tcn, bn_gcn, bn_tcn)

    x_flat = jnp.transpose(x, (0, 2, 1, 3)).reshape(N, T, C * V).astype(jnp.float32)
    out_flat = tcn_gcn_unit_apply_flat(x_flat, *fused, batch_block=batch_block)
    return out_flat.reshape(N, T, Cout, V).transpose(0, 2, 1, 3)


def reference_forward(x, pa, w_gcn, b_gcn, w_tcn, b_tcn, bn_gcn, bn_tcn):
    """Pure-JAX f32 reference of the same forward pass (eval-mode BN)."""
    N, C, T, V = x.shape
    S, Cout, _ = w_gcn.shape
    K = w_tcn.shape[2]
    pad = (K - 1) // 2

    g_g, b_g, m_g, v_g = bn_gcn
    g_t, b_t, m_t, v_t = bn_tcn

    a_n = pa / (jnp.sqrt(jnp.sum(pa * pa, axis=1, keepdims=True)) + 1e-4)
    x2 = x.reshape(N, C * T, V)
    y = jnp.zeros((N, Cout, T, V), jnp.float32)
    for i in range(S):
        xa = jnp.matmul(x2, a_n[i]).reshape(N, C, T, V)
        z = jnp.einsum('oc,nctv->notv', w_gcn[i], xa) + b_gcn[i][None, :, None, None]
        y = y + z
    y = ((y - m_g[None, :, None, None]) / jnp.sqrt(v_g + BN_EPS)[None, :, None, None]
         * g_g[None, :, None, None] + b_g[None, :, None, None])
    y = jnp.maximum(y + x, 0.0)

    yp = jnp.pad(y, ((0, 0), (0, 0), (pad, pad), (0, 0)))
    out = jnp.zeros((N, Cout, T, V), jnp.float32)
    for k in range(K):
        out = out + jnp.einsum('oc,nctv->notv', w_tcn[:, :, k], yp[:, :, k:k + T, :])
    out = out + b_tcn[None, :, None, None]
    out = ((out - m_t[None, :, None, None]) / jnp.sqrt(v_t + BN_EPS)[None, :, None, None]
           * g_t[None, :, None, None] + b_t[None, :, None, None])
    return jnp.maximum(out + x, 0.0)


if __name__ == "__main__":
    # N batch, C channels (in == out), T temporal frames, V joints,
    # S adjacency subsets, K temporal kernel size.
    N, C, T, V, S, K = 2, 8, 16, 16, 3, 5
    Cout = C

    key = jax.random.PRNGKey(0)
    k_x, k_a, k_wg, k_wt, k_bn = jax.random.split(key, 5)

    x = jax.random.normal(k_x, (N, C, T, V), jnp.float32)
    pa = jax.random.normal(k_a, (S, V, V), jnp.float32)            # adaptive PA parameter

    # conv_branch_init: normal(0, sqrt(2 / (out * in * 1 * branches))), bias = 0
    w_gcn = jax.random.normal(k_wg, (S, Cout, C), jnp.float32) * np.sqrt(
        2.0 / (Cout * C * 1 * S))
    b_gcn = jnp.zeros((S, Cout), jnp.float32)

    # unit_tcn conv_init: kaiming_normal fan_out ~ normal(0, sqrt(2/(out*K*1))), bias = 0
    w_tcn = jax.random.normal(k_wt, (Cout, Cout, K), jnp.float32) * np.sqrt(
        2.0 / (Cout * K * 1))
    b_tcn = jnp.zeros((Cout,), jnp.float32)

    fwd = jax.jit(tcn_gcn_unit_forward, static_argnames=('batch_block',))

    # --- check 1: exact module-init state (GCN BN gamma=1e-6, TCN BN gamma=1) ---
    y = fwd(x, pa, w_gcn, b_gcn, w_tcn, b_tcn)
    jax.block_until_ready(y)
    bn_g0 = (jnp.full((Cout,), 1e-6, jnp.float32), jnp.zeros((Cout,), jnp.float32),
             jnp.zeros((Cout,), jnp.float32), jnp.ones((Cout,), jnp.float32))
    bn_t0 = (jnp.ones((Cout,), jnp.float32), jnp.zeros((Cout,), jnp.float32),
             jnp.zeros((Cout,), jnp.float32), jnp.ones((Cout,), jnp.float32))
    y_ref = reference_forward(x, pa, w_gcn, b_gcn, w_tcn, b_tcn, bn_g0, bn_t0)
    np.testing.assert_allclose(np.asarray(y), np.asarray(y_ref), rtol=2e-2, atol=2e-2)

    # --- check 2: non-trivial BN state (gamma ~ 1, real running stats) so the fused
    #     GCN operator + bf16 cast are numerically exercised (addresses review concern).
    ks = jax.random.split(k_bn, 8)
    def u(k, lo, hi):
        return jax.random.uniform(k, (Cout,), jnp.float32, lo, hi)
    bn_g1 = (u(ks[0], 0.5, 1.5), 0.1 * jax.random.normal(ks[1], (Cout,), jnp.float32),
             0.1 * jax.random.normal(ks[2], (Cout,), jnp.float32), u(ks[3], 0.5, 1.5))
    bn_t1 = (u(ks[4], 0.5, 1.5), 0.1 * jax.random.normal(ks[5], (Cout,), jnp.float32),
             0.1 * jax.random.normal(ks[6], (Cout,), jnp.float32), u(ks[7], 0.5, 1.5))
    y1 = fwd(x, pa, w_gcn, b_gcn, w_tcn, b_tcn, bn_g1, bn_t1)
    jax.block_until_ready(y1)
    y1_ref = reference_forward(x, pa, w_gcn, b_gcn, w_tcn, b_tcn, bn_g1, bn_t1)
    np.testing.assert_allclose(np.asarray(y1), np.asarray(y1_ref), rtol=5e-2, atol=5e-2)

    print("KERNEL_OK")
</pallas_src>

<mosaic_0001>
module attributes {stable_mosaic.version = 11 : i64} {
  func.func @_tcn_gcn_kernel(%arg0: i32, %arg1: memref<1x16x128xf32, #tpu.memory_space<vmem>>, %arg2: memref<128x128xbf16, #tpu.memory_space<vmem>>, %arg3: memref<1x128xf32, #tpu.memory_space<vmem>>, %arg4: memref<5x128x128xbf16, #tpu.memory_space<vmem>>, %arg5: memref<1x128xf32, #tpu.memory_space<vmem>>, %arg6: memref<1x16x128xf32, #tpu.memory_space<vmem>>, %arg7: memref<1x20x128xbf16, #tpu.memory_space<vmem>>) attributes {dimension_semantics = [#tpu.dimension_semantics<parallel>], iteration_bounds = array<i64: 2>, scalar_prefetch = 0 : i64, scratch_operands = 1 : i64, tpu.core_type = #tpu.core_type<tc>, window_params = [{transform_indices = @transform_0, window_bounds = array<i64: 1, 16, 128>}, {pipeline_mode = #tpu.pipeline_mode<synchronous>, transform_indices = @transform_1, window_bounds = array<i64: 128, 128>}, {pipeline_mode = #tpu.pipeline_mode<synchronous>, transform_indices = @transform_2, window_bounds = array<i64: 1, 128>}, {pipeline_mode = #tpu.pipeline_mode<synchronous>, transform_indices = @transform_3, window_bounds = array<i64: 5, 128, 128>}, {pipeline_mode = #tpu.pipeline_mode<synchronous>, transform_indices = @transform_4, window_bounds = array<i64: 1, 128>}, {transform_indices = @transform_5, window_bounds = array<i64: 1, 16, 128>}]} {
    %c0 = arith.constant 0 : index
    %c0_0 = arith.constant 0 : index
    %c0_1 = arith.constant 0 : index
    %0 = vector.load %arg1[%c0, %c0_0, %c0_1] : memref<1x16x128xf32, #tpu.memory_space<vmem>>, vector<1x16x128xf32>
    %1 = vector.shape_cast %0 : vector<1x16x128xf32> to vector<16x128xf32>
    %2 = arith.truncf %1 : vector<16x128xf32> to vector<16x128xbf16>
    %c0_2 = arith.constant 0 : index
    %c0_3 = arith.constant 0 : index
    %3 = vector.load %arg2[%c0_2, %c0_3] : memref<128x128xbf16, #tpu.memory_space<vmem>>, vector<128x128xbf16>
    %cst = arith.constant dense<0.000000e+00> : vector<16x128xf32>
    %4 = tpu.matmul %2, %3, %cst {dimension_numbers = #tpu.dot_dimension_numbers<[1], [0], [0], [1], [0, 0, 1, 1], [], []>} : vector<16x128xbf16>, vector<128x128xbf16>, vector<16x128xf32> -> vector<16x128xf32>
    %c0_4 = arith.constant 0 : index
    %c0_5 = arith.constant 0 : index
    %5 = vector.load %arg3[%c0_4, %c0_5] : memref<1x128xf32, #tpu.memory_space<vmem>>, vector<1x128xf32>
    %6 = vector.broadcast %5 : vector<1x128xf32> to vector<16x128xf32>
    %7 = arith.addf %4, %6 : vector<16x128xf32>
    %8 = arith.addf %7, %1 : vector<16x128xf32>
    %cst_6 = arith.constant 0.000000e+00 : f32
    %9 = vector.broadcast %cst_6 : f32 to vector<16x128xf32>
    %10 = arith.maximumf %8, %9 : vector<16x128xf32>
    %cst_7 = arith.constant 0.000000e+00 : bf16
    %11 = vector.broadcast %cst_7 : bf16 to vector<1x2x128xbf16>
    %c0_8 = arith.constant 0 : index
    %c0_9 = arith.constant 0 : index
    %c0_10 = arith.constant 0 : index
    %12 = vector.load %arg7[%c0_8, %c0_9, %c0_10] : memref<1x20x128xbf16, #tpu.memory_space<vmem>>, vector<1x2x128xbf16>
    tpu.vector_store %arg7[%c0_8, %c0_9, %c0_10], %11 {strides = array<i32>} : memref<1x20x128xbf16, #tpu.memory_space<vmem>>, vector<1x2x128xbf16>,
    %cst_11 = arith.constant 0.000000e+00 : bf16
    %13 = vector.broadcast %cst_11 : bf16 to vector<1x2x128xbf16>
    %c0_12 = arith.constant 0 : index
    %c18 = arith.constant 18 : index
    %c0_13 = arith.constant 0 : index
    %14 = vector.load %arg7[%c0_12, %c18, %c0_13] : memref<1x20x128xbf16, #tpu.memory_space<vmem>>, vector<1x2x128xbf16>
    tpu.vector_store %arg7[%c0_12, %c18, %c0_13], %13 {strides = array<i32>} : memref<1x20x128xbf16, #tpu.memory_space<vmem>>, vector<1x2x128xbf16>,
    %15 = arith.truncf %10 : vector<16x128xf32> to vector<16x128xbf16>
    %16 = vector.shape_cast %15 : vector<16x128xbf16> to vector<1x16x128xbf16>
    %c0_14 = arith.constant 0 : index
    %c2 = arith.constant 2 : index
    %c0_15 = arith.constant 0 : index
    %17 = vector.load %arg7[%c0_14, %c2, %c0_15] : memref<1x20x128xbf16, #tpu.memory_space<vmem>>, vector<1x16x128xbf16>
    tpu.vector_store %arg7[%c0_14, %c2, %c0_15], %16 {strides = array<i32>} : memref<1x20x128xbf16, #tpu.memory_space<vmem>>, vector<1x16x128xbf16>,
    %c0_16 = arith.constant 0 : index
    %c0_17 = arith.constant 0 : index
    %c0_18 = arith.constant 0 : index
    %18 = vector.load %arg7[%c0_16, %c0_17, %c0_18] : memref<1x20x128xbf16, #tpu.memory_space<vmem>>, vector<1x16x128xbf16>
    %19 = vector.shape_cast %18 : vector<1x16x128xbf16> to vector<16x128xbf16>
    %c0_19 = arith.constant 0 : index
    %c0_20 = arith.constant 0 : index
    %c0_21 = arith.constant 0 : index
    %20 = vector.load %arg4[%c0_19, %c0_20, %c0_21] : memref<5x128x128xbf16, #tpu.memory_space<vmem>>, vector<1x128x128xbf16>
    %21 = vector.shape_cast %20 : vector<1x128x128xbf16> to vector<128x128xbf16>
    %cst_22 = arith.constant dense<0.000000e+00> : vector<16x128xf32>
    %22 = tpu.matmul %19, %21, %cst_22 {dimension_numbers = #tpu.dot_dimension_numbers<[1], [0], [0], [1], [0, 0, 1, 1], [], []>} : vector<16x128xbf16>, vector<128x128xbf16>, vector<16x128xf32> -> vector<16x128xf32>
    %c0_23 = arith.constant 0 : index
    %c1 = arith.constant 1 : index
    %c0_24 = arith.constant 0 : index
    %23 = vector.load %arg7[%c0_23, %c1, %c0_24] : memref<1x20x128xbf16, #tpu.memory_space<vmem>>, vector<1x16x128xbf16>
    %24 = vector.shape_cast %23 : vector<1x16x128xbf16> to vector<16x128xbf16>
    %c1_25 = arith.constant 1 : index
    %c0_26 = arith.constant 0 : index
    %c0_27 = arith.constant 0 : index
    %25 = vector.load %arg4[%c1_25, %c0_26, %c0_27] : memref<5x128x128xbf16, #tpu.memory_space<vmem>>, vector<1x128x128xbf16>
    %26 = vector.shape_cast %25 : vector<1x128x128xbf16> to vector<128x128xbf16>
    %cst_28 = arith.constant dense<0.000000e+00> : vector<16x128xf32>
    %27 = tpu.matmul %24, %26, %cst_28 {dimension_numbers = #tpu.dot_dimension_numbers<[1], [0], [0], [1], [0, 0, 1, 1], [], []>} : vector<16x128xbf16>, vector<128x128xbf16>, vector<16x128xf32> -> vector<16x128xf32>
    %28 = arith.addf %22, %27 : vector<16x128xf32>
    %c0_29 = arith.constant 0 : index
    %c2_30 = arith.constant 2 : index
    %c0_31 = arith.constant 0 : index
    %29 = vector.load %arg7[%c0_29, %c2_30, %c0_31] : memref<1x20x128xbf16, #tpu.memory_space<vmem>>, vector<1x16x128xbf16>
    %30 = vector.shape_cast %29 : vector<1x16x128xbf16> to vector<16x128xbf16>
    %c2_32 = arith.constant 2 : index
    %c0_33 = arith.constant 0 : index
    %c0_34 = arith.constant 0 : index
    %31 = vector.load %arg4[%c2_32, %c0_33, %c0_34] : memref<5x128x128xbf16, #tpu.memory_space<vmem>>, vector<1x128x128xbf16>
    %32 = vector.shape_cast %31 : vector<1x128x128xbf16> to vector<128x128xbf16>
    %cst_35 = arith.constant dense<0.000000e+00> : vector<16x128xf32>
    %33 = tpu.matmul %30, %32, %cst_35 {dimension_numbers = #tpu.dot_dimension_numbers<[1], [0], [0], [1], [0, 0, 1, 1], [], []>} : vector<16x128xbf16>, vector<128x128xbf16>, vector<16x128xf32> -> vector<16x128xf32>
    %34 = arith.addf %28, %33 : vector<16x128xf32>
    %c0_36 = arith.constant 0 : index
    %c3 = arith.constant 3 : index
    %c0_37 = arith.constant 0 : index
    %35 = vector.load %arg7[%c0_36, %c3, %c0_37] : memref<1x20x128xbf16, #tpu.memory_space<vmem>>, vector<1x16x128xbf16>
    %36 = vector.shape_cast %35 : vector<1x16x128xbf16> to vector<16x128xbf16>
    %c3_38 = arith.constant 3 : index
    %c0_39 = arith.constant 0 : index
    %c0_40 = arith.constant 0 : index
    %37 = vector.load %arg4[%c3_38, %c0_39, %c0_40] : memref<5x128x128xbf16, #tpu.memory_space<vmem>>, vector<1x128x128xbf16>
    %38 = vector.shape_cast %37 : vector<1x128x128xbf16> to vector<128x128xbf16>
    %cst_41 = arith.constant dense<0.000000e+00> : vector<16x128xf32>
    %39 = tpu.matmul %36, %38, %cst_41 {dimension_numbers = #tpu.dot_dimension_numbers<[1], [0], [0], [1], [0, 0, 1, 1], [], []>} : vector<16x128xbf16>, vector<128x128xbf16>, vector<16x128xf32> -> vector<16x128xf32>
    %40 = arith.addf %34, %39 : vector<16x128xf32>
    %c0_42 = arith.constant 0 : index
    %c4 = arith.constant 4 : index
    %c0_43 = arith.constant 0 : index
    %41 = vector.load %arg7[%c0_42, %c4, %c0_43] : memref<1x20x128xbf16, #tpu.memory_space<vmem>>, vector<1x16x128xbf16>
    %42 = vector.shape_cast %41 : vector<1x16x128xbf16> to vector<16x128xbf16>
    %c4_44 = arith.constant 4 : index
    %c0_45 = arith.constant 0 : index
    %c0_46 = arith.constant 0 : index
    %43 = vector.load %arg4[%c4_44, %c0_45, %c0_46] : memref<5x128x128xbf16, #tpu.memory_space<vmem>>, vector<1x128x128xbf16>
    %44 = vector.shape_cast %43 : vector<1x128x128xbf16> to vector<128x128xbf16>
    %cst_47 = arith.constant dense<0.000000e+00> : vector<16x128xf32>
    %45 = tpu.matmul %42, %44, %cst_47 {dimension_numbers = #tpu.dot_dimension_numbers<[1], [0], [0], [1], [0, 0, 1, 1], [], []>} : vector<16x128xbf16>, vector<128x128xbf16>, vector<16x128xf32> -> vector<16x128xf32>
    %46 = arith.addf %40, %45 : vector<16x128xf32>
    %c0_48 = arith.constant 0 : index
    %c0_49 = arith.constant 0 : index
    %47 = vector.load %arg5[%c0_48, %c0_49] : memref<1x128xf32, #tpu.memory_space<vmem>>, vector<1x128xf32>
    %48 = vector.broadcast %47 : vector<1x128xf32> to vector<16x128xf32>
    %49 = arith.addf %46, %48 : vector<16x128xf32>
    %c0_50 = arith.constant 0 : index
    %c0_51 = arith.constant 0 : index
    %c0_52 = arith.constant 0 : index
    %50 = vector.load %arg1[%c0_50, %c0_51, %c0_52] : memref<1x16x128xf32, #tpu.memory_space<vmem>>, vector<1x16x128xf32>
    %51 = vector.shape_cast %50 : vector<1x16x128xf32> to vector<16x128xf32>
    %52 = arith.addf %49, %51 : vector<16x128xf32>
    %cst_53 = arith.constant 0.000000e+00 : f32
    %53 = vector.broadcast %cst_53 : f32 to vector<16x128xf32>
    %54 = arith.maximumf %52, %53 : vector<16x128xf32>
    %55 = vector.shape_cast %54 : vector<16x128xf32> to vector<1x16x128xf32>
    %c0_54 = arith.constant 0 : index
    %c0_55 = arith.constant 0 : index
    %c0_56 = arith.constant 0 : index
    %56 = vector.load %arg6[%c0_54, %c0_55, %c0_56] : memref<1x16x128xf32, #tpu.memory_space<vmem>>, vector<1x16x128xf32>
    tpu.vector_store %arg6[%c0_54, %c0_55, %c0_56], %55 {strides = array<i32>} : memref<1x16x128xf32, #tpu.memory_space<vmem>>, vector<1x16x128xf32>,
    return
  }
  func.func @transform_0(%arg0: i32) -> (i32, i32, i32) {
    %c0_i32 = arith.constant 0 : i32
    %c0_i32_0 = arith.constant 0 : i32
    %c0_i32_1 = arith.constant 0 : i32
    return %arg0, %c0_i32, %c0_i32_0 : i32, i32, i32
  }
  func.func @transform_1(%arg0: i32) -> (i32, i32) {
    %c0_i32 = arith.constant 0 : i32
    %c0_i32_0 = arith.constant 0 : i32
    %c0_i32_1 = arith.constant 0 : i32
    return %c0_i32, %c0_i32_0 : i32, i32
  }
  func.func @transform_2(%arg0: i32) -> (i32, i32) {
    %c0_i32 = arith.constant 0 : i32
    %c0_i32_0 = arith.constant 0 : i32
    %c0_i32_1 = arith.constant 0 : i32
    return %c0_i32, %c0_i32_0 : i32, i32
  }
  func.func @transform_3(%arg0: i32) -> (i32, i32, i32) {
    %c0_i32 = arith.constant 0 : i32
    %c0_i32_0 = arith.constant 0 : i32
    %c0_i32_1 = arith.constant 0 : i32
    %c0_i32_2 = arith.constant 0 : i32
    return %c0_i32, %c0_i32_0, %c0_i32_1 : i32, i32, i32
  }
  func.func @transform_4(%arg0: i32) -> (i32, i32) {
    %c0_i32 = arith.constant 0 : i32
    %c0_i32_0 = arith.constant 0 : i32
    %c0_i32_1 = arith.constant 0 : i32
    return %c0_i32, %c0_i32_0 : i32, i32
  }
  func.func @transform_5(%arg0: i32) -> (i32, i32, i32) {
    %c0_i32 = arith.constant 0 : i32
    %c0_i32_0 = arith.constant 0 : i32
    %c0_i32_1 = arith.constant 0 : i32
    return %arg0, %c0_i32, %c0_i32_0 : i32, i32, i32
  }
}

</mosaic_0001>

<bundles_post_ra>
// kernel: mul.17
= control target key start
LH: loop header
LB: loop body
LE: loop exit
PB: predicated region body
PF: predicated region fallthrough
CT: control target
= control target key end

     0   :  { %s25_s0 = inlined_call_operand.vmem [shape: f32[8], index: 0, kind: input, shape index: {}]   ;;  %s26_s1 = inlined_call_operand.vmem [shape: f32[8,16], index: 1, kind: output, shape index: {}]  }
   0x1   :  { %v4_v0 = vld [vmem:[%s25_s0] ss:$0 sm:$0xff] }
   0x2   :  { %6 = vbcast.lane.b32.xlu0 %v4_v0, 256 }
  0x74   :  { %v7_v1 = vpop.permute.xlu0 %6 }
  0x75   :  { %8 = vst [vmem:[%s26_s1] sm:$0xff] %v7_v1 }

// kernel: tcn_gcn_unit_forward.1
= control target key start
LH: loop header
LB: loop body
LE: loop exit
PB: predicated region body
PF: predicated region fallthrough
CT: control target
= control target key end

     0   :  { %s1456_s18 = smov 0   ;;  %s1714_s0 = inlined_call_operand.vmem [shape: f32[2,16,128], index: 0, kind: input, shape index: {}]   ;;  %s1715_s1 = inlined_call_operand.vmem [shape: bf16[128,128], index: 1, kind: input, shape index: {}]   ;;  %s1716_s2 = inlined_call_operand.vmem [shape: f32[1,128], index: 2, kind: input, shape index: {}]   ;;  %s1717_s3 = inlined_call_operand.vmem [shape: bf16[5,128,128], index: 3, kind: input, shape index: {}]   ;;  %s1718_s4 = inlined_call_operand.vmem [shape: f32[1,128], index: 4, kind: input, shape index: {}]   ;;  %s1719_s5 = inlined_call_operand.vmem [shape: f32[2,16,128], index: 5, kind: output, shape index: {}]  }
   0x1 LB: > { %s1041_s19 = sadd.s32 4294967295, %s1421_s18   ;;  %p1045_p0 = scmp.ge.s32.totalorder %s1421_s18, 1  ;;  %s1421_s18 = sphi %s1456_s18, %s15_s18  }
   0x2   : > { %p187_p1 = scmp.lt.s32.totalorder %s1421_s18, 3 }
   0x4   : > { %p188_p2 = pnand %p1045_p0, %p187_p1 }
   0x5   : > { %p215_p3 = scmp.lt.s32.totalorder (!%p188_p2), %s1041_s19, 1 }
   0x6   : > { %191 = sbr.rel (%p188_p2) target bundleno = 539 (0x21b), region = 40 }
   0xb   : > { %v1362_v0 = vld [vmem:[%s1715_s1 + $0x38] sm:$0xff]   ;;  %v1423_v1 = vmov 0.0   ;;  %v1363_v2 = vld [vmem:[%s1715_s1 + $0x30] sm:$0xff]   ;;  %vm1424_vm0 = vmmov 0   ;;  %v1364_v3 = vld [vmem:[%s1715_s1 + $0x28] sm:$0xff]   ;;  %s1721_s19 = smov (!%p215_p3, %s1041_s19), 1 }
   0xc   : > { %1231 = vmatprep.subr.bf16.mxu0 %v1423_v1  ;;  %1251 = vmatprep.subr.bf16.mxu1 %v1423_v1  ;;  %v1365_v4 = vld [vmem:[%s1715_s1 + $0x20] sm:$0xff]   ;;  %s1173_s28 = sshll.u32 %s1721_s19, 4  ;;  %v1366_v5 = vld [vmem:[%s1715_s1 + $0x18] sm:$0xff]   ;;  %v1367_v6 = vld [vmem:[%s1715_s1 + $0x10] sm:$0xff]   ;;  %v1425_v21 = vmov 0   ;;  %vm353_vm1 = vcmask 1040384  }
   0xd   : > { %1232 = vmatpush3.bf16.msra.mxu0 %v1362_v0  ;;  %1247 = vmatprep.mubr.msk.bf16.mxu0 %vm1424_vm0, %v1423_v1  ;;  %v1368_v7 = vld [vmem:[%s1715_s1 + $0x8] sm:$0xff]   ;;  %s219_s12 = scalar_lea.vmem %s1714_s0, %s1173_s28  ;;  %v1369_v8 = vld [vmem:[%s1715_s1] sm:$0xff]   ;;  %v1370_v11 = vld [vmem:[%s1717_s3 + $0x38] sm:$0xff]   ;;  %345 = vst [vmem:[#allocation2] sm:$0x1] %v1425_v21  ;;  %vm354_vm2 = vcmask 1044484   ;;  %s224_s13 = scalar_lea.vmem %s1719_s5, %s1173_s28 }
   0xe   : > { %1233 = vmatprep.subr.bf16.mxu0 %v1423_v1  ;;  %1267 = vmatprep.mubr.msk.bf16.mxu1 %vm1424_vm0, %v1423_v1  ;;  %v1508_v9 = vld [vmem:[%s219_s12] sm:$0xff]  ;;  %v1510_v10 = vld [vmem:[%s219_s12 + $0x8] sm:$0xff]  ;;  %v1371_v13 = vld [vmem:[%s1717_s3 + $0x30] sm:$0xff]   ;;  %vm411_vm4 = vsmask.f32 7424  ;;  %vm625_vm6 = vcmask 1046528  }
   0xf   : > { %v228_v12 = vpack.c.bf16 %v1510_v10, %v1508_v9  ;;  %v1372_v14 = vld [vmem:[%s1717_s3 + $0x78] sm:$0xff]   ;;  %v1373_v15 = vld [vmem:[%s1717_s3 + $0x28] sm:$0xff]   ;;  %v1374_v16 = vld [vmem:[%s1717_s3 + $0x70] sm:$0xff]   ;;  %vm742_vm5 = vsmask.f32 6400  ;;  %vm873_vm7 = vcmask 1045504  }
  0x10   : > { %1252 = vmatpush3.bf16.msra.mxu1 %v1372_v14  ;;  %v1375_v17 = vld [vmem:[%s1717_s3 + $0x20] sm:$0xff]   ;;  %v1376_v18 = vld [vmem:[%s1717_s3 + $0x68] sm:$0xff]   ;;  %v1377_v19 = vld [vmem:[%s1717_s3 + $0x18] sm:$0xff]  }
  0x11   : > { %1234 = vmatpush3.bf16.msra.mxu0 %v1363_v2  ;;  %1253 = vmatprep.subr.bf16.mxu1 %v1423_v1  ;;  %v1378_v20 = vld [vmem:[%s1717_s3 + $0x60] sm:$0xff]   ;;  %v1379_v22 = vld [vmem:[%s1717_s3 + $0x10] sm:$0xff]   ;;  %v1380_v23 = vld [vmem:[%s1717_s3 + $0x58] sm:$0xff]  }
  0x12   : > { %1235 = vmatprep.subr.bf16.mxu0 %v1423_v1  ;;  %v1381_v24 = vld [vmem:[%s1717_s3 + $0x8] sm:$0xff]   ;;  %v1382_v25 = vld [vmem:[%s1717_s3 + $0x50] sm:$0xff]   ;;  %v1383_v26 = vld [vmem:[%s1717_s3] sm:$0xff]  }
  0x13   : > { %v1384_v27 = vld [vmem:[%s1717_s3 + $0x48] sm:$0xff]   ;;  %v1388_v28 = vld [vmem:[%s1717_s3 + $0x40] sm:$0xff]   ;;  %vm355_vm3 = vmor %vm353_vm1, %vm354_vm2 }
  0x14   : > { %1254 = vmatpush3.bf16.msra.mxu1 %v1374_v16  ;;  %v1050_v29 = vld [vmem:[%s1716_s2] ss:$0 sm:$0xff]  ;;  %v1387_v49 = vld [vmem:[%s1717_s3 + $0xf8] sm:$0xff]   ;;  %v1389_v54 = vld [vmem:[%s1717_s3 + $0xf0] sm:$0xff]  }
  0x15   : > { %1236 = vmatpush3.bf16.msra.mxu0 %v1364_v3  ;;  %1255 = vmatprep.subr.bf16.mxu1 %v1423_v1  ;;  %v1391_v59 = vld [vmem:[%s1717_s3 + $0xb8] sm:$0xff]   ;;  %v1392_v60 = vld [vmem:[%s1717_s3 + $0xe8] sm:$0xff]   ;;  %v1393_v62 = vld [vmem:[%s1717_s3 + $0xb0] sm:$0xff]  }
  0x16   : > { %1237 = vmatprep.subr.bf16.mxu0 %v1423_v1  ;;  %v1394_v63 = vld [vmem:[%s1717_s3 + $0xe0] sm:$0xff]   ;;  %v1395_v0 = vld [vmem:[%s1717_s3 + $0xa8] sm:$0xff]   ;;  %v1396_v2 = vld [vmem:[%s1717_s3 + $0xd8] sm:$0xff]  }
  0x17   : > { %v1399_v14 = vld [vmem:[%s1717_s3 + $0x98] sm:$0xff]   ;;  %v1402_v21 = vld [vmem:[%s1717_s3 + $0xc0] sm:$0xff]  }
  0x18   : > { %1256 = vmatpush3.bf16.msra.mxu1 %v1376_v18 }
  0x19   : > { %1238 = vmatpush3.bf16.msra.mxu0 %v1365_v4  ;;  %1257 = vmatprep.subr.bf16.mxu1 %v1423_v1 }
  0x1a   : > { %1239 = vmatprep.subr.bf16.mxu0 %v1423_v1 }
  0x1c   : > { %1258 = vmatpush3.bf16.msra.mxu1 %v1378_v20  ;;  %v1401_v20 = vld [vmem:[%s1717_s3 + $0x90] sm:$0xff]  }
  0x1d   : > { %1240 = vmatpush3.bf16.msra.mxu0 %v1366_v5  ;;  %1259 = vmatprep.subr.bf16.mxu1 %v1423_v1 }
  0x1e   : > { %1241 = vmatprep.subr.bf16.mxu0 %v1423_v1 }
  0x20   : > { %1260 = vmatpush3.bf16.msra.mxu1 %v1380_v23 }
  0x21   : > { %1242 = vmatpush3.bf16.msra.mxu0 %v1367_v6  ;;  %1261 = vmatprep.subr.bf16.mxu1 %v1423_v1  ;;  %v1397_v6 = vld [vmem:[%s1717_s3 + $0xa0] sm:$0xff]  }
  0x22   : > { %1243 = vmatprep.subr.bf16.mxu0 %v1423_v1 }
  0x24   : > { %1262 = vmatpush3.bf16.msra.mxu1 %v1382_v25 }
  0x25   : > { %1244 = vmatpush3.bf16.msra.mxu0 %v1368_v7  ;;  %1263 = vmatprep.subr.bf16.mxu1 %v1423_v1  ;;  %v1398_v7 = vld [vmem:[%s1717_s3 + $0xd0] sm:$0xff]  }
  0x26   : > { %1245 = vmatprep.subr.bf16.mxu0 %v1423_v1 }
  0x28   : > { %1264 = vmatpush3.bf16.msra.mxu1 %v1384_v27 }
  0x29   : > { %1246 = vmatpush3.bf16.msra.mxu0 %v1369_v8  ;;  %1265 = vmatprep.subr.bf16.mxu1 %v1423_v1 }
  0x2a   : > { %1271 = vmatprep.subr.bf16.mxu0 %v1423_v1 }
  0x2c   : > { %1248 = vmatmul.mubr.bf16.vlgmr.msra.gmra.mxu0 %v228_v12  ;;  %1266 = vmatpush3.bf16.msra.mxu1 %v1388_v28 }
  0x2d   : > { %1272 = vmatpush3.bf16.msra.mxu0 %v1370_v11  ;;  %1287 = vmatprep.mubr.msk.bf16.mxu0 %vm1424_vm0, %v1423_v1 }
  0x2e   : > { %1273 = vmatprep.subr.bf16.mxu0 %v1423_v1  ;;  %1291 = vmatprep.subr.bf16.mxu1 %v1423_v1 }
  0x31   : > { %1274 = vmatpush3.bf16.msra.mxu0 %v1371_v13 }
  0x32   : > { %1275 = vmatprep.subr.bf16.mxu0 %v1423_v1 }
  0x35   : > { %1276 = vmatpush3.bf16.msra.mxu0 %v1373_v15  ;;  %v1400_v15 = vld [vmem:[%s1717_s3 + $0xc8] sm:$0xff]  }
  0x36   : > { %1277 = vmatprep.subr.bf16.mxu0 %v1423_v1 }
  0x39   : > { %1278 = vmatpush3.bf16.msra.mxu0 %v1375_v17 }
  0x3a   : > { %1279 = vmatprep.subr.bf16.mxu0 %v1423_v1 }
  0x3d   : > { %1280 = vmatpush3.bf16.msra.mxu0 %v1377_v19 }
  0x3e   : > { %1281 = vmatprep.subr.bf16.mxu0 %v1423_v1 }
  0x41   : > { %1282 = vmatpush3.bf16.msra.mxu0 %v1379_v22 }
  0x42   : > { %1283 = vmatprep.subr.bf16.mxu0 %v1423_v1 }
  0x45   : > { %1284 = vmatpush3.bf16.msra.mxu0 %v1381_v24  ;;  %v1403_v24 = vld [vmem:[%s1717_s3 + $0x88] sm:$0xff]  }
  0x46   : > { %1285 = vmatprep.subr.bf16.mxu0 %v1423_v1 }
  0x49   : > { %1286 = vmatpush3.bf16.msra.mxu0 %v1383_v26  ;;  %v1405_v26 = vld [vmem:[%s1717_s3 + $0x80] sm:$0xff]  }
  0x4a   : > { %1311 = vmatprep.subr.bf16.mxu0 %v1423_v1 }
  0xec   : > { %v334_v30 = vpop.f32.mrf.mxu0 }
  0xed   : > { %v335_v31 = vadd.f32 %v1050_v29, %v334_v30 }
  0xee   : > { %v1249_v32 = vpop.f32.mrf.mxu0 }
  0xef   : > { %v341_v33 = vadd.f32 %v335_v31, %v1508_v9  ;;  %v1407_v31 = vld [vmem:[%s1717_s3 + $0x130] sm:$0xff]   ;;  %v1408_v32 = vld [vmem:[%s1717_s3 + $0x128] sm:$0xff]  }
  0xf0   : > { %v337_v34 = vpop.f32.mrf.mxu0 }
  0xf1   : > { %v343_v35 = vmax.f32 %v341_v33, 0.0  ;;  %v338_v36 = vadd.f32 %v1050_v29, %v337_v34  ;;  %v1406_v29 = vld [vmem:[%s1717_s3 + $0x138] sm:$0xff]   ;;  %v1409_v33 = vld [vmem:[%s1717_s3 + $0x120] sm:$0xff]  }
  0xf2   : > { %v1250_v37 = vpop.f32.mrf.mxu0  ;;  %v1410_v34 = vld [vmem:[%s1717_s3 + $0x118] sm:$0xff]  }
  0xf3   : > { %v1175_v38 = vpack.c.bf16 %v343_v35, %v343_v35  ;;  %v342_v39 = vadd.f32 %v338_v36, %v1510_v10  ;;  %v1411_v35 = vld [vmem:[%s1717_s3 + $0x110] sm:$0xff]   ;;  %v1412_v36 = vld [vmem:[%s1717_s3 + $0x108] sm:$0xff]  }
  0xf5   : > { %v356_v40 = vrot.slane %v1175_v38, 7  ;;  %v344_v41 = vmax.f32 %v342_v39, 0.0  ;;  %v1413_v39 = vld [vmem:[%s1717_s3 + $0x100] sm:$0xff]  }
  0xf7   : > { %364 = vst [vmem:[#allocation2] sm:$0xe] %v356_v40  ;;  %v1176_v42 = vpack.c.bf16 %v344_v41, %v344_v41  ;;  %v357_v43 = vrot.slane %v356_v40, 4 }
  0xf9   : > { %v358_v44 = vrot.slane %v1176_v42, 7 }
  0xfb   : > { %v359_v45 = vsel %vm355_vm3, %v357_v43, %v358_v44  ;;  %v360_v46 = vrot.slane %v358_v44, 4 }
  0xfc   : > { %365 = vst [vmem:[#allocation2 + $0x4] sm:$0xf] %v359_v45 }
  0xfd   : > { %366 = vst [vmem:[#allocation2 + $0x8] sm:$0x1] %v360_v46 }
  0xfe   : > { %v367_v47 = vld [vmem:[#allocation2] sm:$0xf] }
  0xff   : > { %v604_v3 = vld [vmem:[#allocation2] sm:$0xe] }
 0x100   : > { %v852_v37 = vld [vmem:[#allocation2] sm:$0xc] }
 0x103   : > { %v1587_v48 = vld [vmem:[#allocation2 + $0x4] sm:$0xf] }
 0x104   : > { %v1077_v50 = vcombine.low %v367_v47, %v1587_v48  ;;  %v1593_v51 = vld [vmem:[#allocation2 + $0x8] ss:$0 sps:$4 sm:$0x11]   ;;  %v1111_v4 = vcombine.low %v604_v3, %v1587_v48  ;;  %v1161_v38 = vcombine.low %v852_v37, %v1587_v48 }
 0x105   : > { %v420_v53 = vshll.u32 %v1593_v51, 16  ;;  %v1628_v5 = vld [vmem:[#allocation2 + $0x8] ss:$0 sps:$4 sm:$0x33]   ;;  %v627_v28 = vrot.slane %v1593_v51, 1 }
 0x106   : > { %1288 = vmatmul.mubr.bf16.vlgmr.msra.gmra.mxu0 %v1077_v50  ;;  %v415_v52 = vshll.u32 %v1077_v50, 16  ;;  %v413_v55 = vshrl.u32 %v1077_v50, 16  ;;  %v744_v8 = vshrl.u32 %v1111_v4, 16  ;;  %v747_v11 = vshll.u32 %v1111_v4, 16 }
 0x107   : > { %1312 = vmatpush3.bf16.msra.mxu0 %v1387_v49  ;;  %1327 = vmatprep.mubr.msk.bf16.mxu0 %vm1424_vm0, %v1423_v1  ;;  %v422_v58 = vrot.slane %v420_v53, 1  ;;  %v752_v12 = vshrl.u32 %v1628_v5, 16  ;;  %v755_v13 = vshll.u32 %v1628_v5, 16  ;;  %v626_v27 = vrot.slane %v1111_v4, 1 }
 0x108   : > { %1313 = vmatprep.subr.bf16.mxu0 %v1423_v1  ;;  %v417_v56 = vrot.slane %v415_v52, 1  ;;  %v746_v16 = vrot.slane %v744_v8, 1  ;;  %v749_v17 = vrot.slane %v747_v11, 2  ;;  %v874_v40 = vrot.slane %v1161_v38, 2 }
 0x109   : > { %v754_v18 = vrot.slane %v752_v12, 1  ;;  %v757_v19 = vrot.slane %v755_v13, 2  ;;  %v628_v30 = vsel %vm625_vm6, %v626_v27, %v627_v28  ;;  %v875_v41 = vrot.slane %v1628_v5, 2 }
 0x10a   : > { %v418_v57 = vor.u32 %v417_v56, %v413_v55  ;;  %v750_v22 = vor.u32 %v749_v17, %v746_v16 }
 0x10b   : > { %1314 = vmatpush3.bf16.msra.mxu0 %v1389_v54  ;;  %v758_v23 = vor.u32 %v757_v19, %v754_v18  ;;  %v876_v42 = vsel %vm873_vm7, %v874_v40, %v875_v41 }
 0x10c   : > { %v423_v61 = vsel %vm411_vm4, %v418_v57, %v422_v58  ;;  %1315 = vmatprep.subr.bf16.mxu0 %v1423_v1 }
 0x10d   : > { %1268 = vmatmul.mubr.bf16.vlgmr.msra.gmra.mxu1 %v423_v61  ;;  %v759_v25 = vsel %vm742_vm5, %v750_v22, %v758_v23 }
 0x10e   : > { %1292 = vmatpush3.bf16.msra.mxu1 %v1391_v59  ;;  %1307 = vmatprep.mubr.msk.bf16.mxu1 %vm1424_vm0, %v1423_v1 }
 0x10f   : > { %1316 = vmatpush3.bf16.msra.mxu0 %v1392_v60  ;;  %1293 = vmatprep.subr.bf16.mxu1 %v1423_v1 }
 0x110   : > { %1317 = vmatprep.subr.bf16.mxu0 %v1423_v1 }
 0x112   : > { %1294 = vmatpush3.bf16.msra.mxu1 %v1393_v62 }
 0x113   : > { %1318 = vmatpush3.bf16.msra.mxu0 %v1394_v63  ;;  %1295 = vmatprep.subr.bf16.mxu1 %v1423_v1 }
 0x114   : > { %1319 = vmatprep.subr.bf16.mxu0 %v1423_v1 }
 0x116   : > { %1296 = vmatpush3.bf16.msra.mxu1 %v1395_v0  ;;  %v1170_v0 = vld [vmem:[%s1718_s4] ss:$0 sm:$0xff] }
 0x117   : > { %1320 = vmatpush3.bf16.msra.mxu0 %v1396_v2  ;;  %1297 = vmatprep.subr.bf16.mxu1 %v1423_v1 }
 0x118   : > { %1321 = vmatprep.subr.bf16.mxu0 %v1423_v1 }
 0x11a   : > { %1298 = vmatpush3.bf16.msra.mxu1 %v1397_v6 }
 0x11b   : > { %1322 = vmatpush3.bf16.msra.mxu0 %v1398_v7  ;;  %1299 = vmatprep.subr.bf16.mxu1 %v1423_v1 }
 0x11c   : > { %1323 = vmatprep.subr.bf16.mxu0 %v1423_v1 }
 0x11e   : > { %1300 = vmatpush3.bf16.msra.mxu1 %v1399_v14 }
 0x11f   : > { %1324 = vmatpush3.bf16.msra.mxu0 %v1400_v15  ;;  %1301 = vmatprep.subr.bf16.mxu1 %v1423_v1 }
 0x120   : > { %1325 = vmatprep.subr.bf16.mxu0 %v1423_v1 }
 0x122   : > { %1302 = vmatpush3.bf16.msra.mxu1 %v1401_v20 }
 0x123   : > { %1326 = vmatpush3.bf16.msra.mxu0 %v1402_v21  ;;  %1303 = vmatprep.subr.bf16.mxu1 %v1423_v1 }
 0x126   : > { %1304 = vmatpush3.bf16.msra.mxu1 %v1403_v24  ;;  %1328 = vmatmul.mubr.bf16.vlgmr.msra.gmra.mxu0 %v759_v25 }
 0x127   : > { %1305 = vmatprep.subr.bf16.mxu1 %v1423_v1 }
 0x12a   : > { %1306 = vmatpush3.bf16.msra.mxu1 %v1405_v26 }
 0x12b   : > { %1331 = vmatprep.subr.bf16.mxu1 %v1423_v1 }
 0x12d   : > { %1308 = vmatmul.mubr.bf16.vlgmr.msra.gmra.mxu1 %v628_v30 }
 0x12e   : > { %1332 = vmatpush3.bf16.msra.mxu1 %v1406_v29  ;;  %1347 = vmatprep.mubr.msk.bf16.mxu1 %vm1424_vm0, %v1423_v1 }
 0x12f   : > { %1333 = vmatprep.subr.bf16.mxu1 %v1423_v1 }
 0x132   : > { %1334 = vmatpush3.bf16.msra.mxu1 %v1407_v31 }
 0x133   : > { %1335 = vmatprep.subr.bf16.mxu1 %v1423_v1 }
 0x136   : > { %1336 = vmatpush3.bf16.msra.mxu1 %v1408_v32 }
 0x137   : > { %1337 = vmatprep.subr.bf16.mxu1 %v1423_v1 }
 0x13a   : > { %1338 = vmatpush3.bf16.msra.mxu1 %v1409_v33 }
 0x13b   : > { %1339 = vmatprep.subr.bf16.mxu1 %v1423_v1 }
 0x13e   : > { %1340 = vmatpush3.bf16.msra.mxu1 %v1410_v34 }
 0x13f   : > { %1341 = vmatprep.subr.bf16.mxu1 %v1423_v1 }
 0x142   : > { %1342 = vmatpush3.bf16.msra.mxu1 %v1411_v35 }
 0x143   : > { %1343 = vmatprep.subr.bf16.mxu1 %v1423_v1 }
 0x146   : > { %1344 = vmatpush3.bf16.msra.mxu1 %v1412_v36 }
 0x147   : > { %1345 = vmatprep.subr.bf16.mxu1 %v1423_v1 }
 0x14a   : > { %1346 = vmatpush3.bf16.msra.mxu1 %v1413_v39 }
 0x14d   : > { %1348 = vmatmul.mubr.bf16.vlgmr.msra.gmra.mxu1 %v876_v42 }
 0x1c6   : > { %v597_v43 = vpop.f32.mrf.mxu0 }
 0x1c8   : > { %v1289_v44 = vpop.f32.mrf.mxu0 }
 0x1ca   : > { %v600_v45 = vpop.f32.mrf.mxu0 }
 0x1cc   : > { %v1290_v46 = vpop.f32.mrf.mxu0 }
 0x1cd   : > { %v507_v47 = vpop.f32.mrf.mxu1 }
 0x1ce   : > { %v598_v58 = vadd.f32 %v597_v43, %v507_v47 }
 0x1cf   : > { %v1269_v48 = vpop.f32.mrf.mxu1 }
 0x1d1   : > { %v510_v49 = vpop.f32.mrf.mxu1 }
 0x1d2   : > { %v601_v60 = vadd.f32 %v600_v45, %v510_v49 }
 0x1d3   : > { %v1270_v50 = vpop.f32.mrf.mxu1 }
 0x1e6   : > { %v843_v51 = vpop.f32.mrf.mxu0 }
 0x1e8   : > { %v1329_v52 = vpop.f32.mrf.mxu0 }
 0x1ea   : > { %v846_v53 = vpop.f32.mrf.mxu0 }
 0x1ec   : > { %v1330_v54 = vpop.f32.mrf.mxu0 }
 0x1ed   : > { %v712_v1 = vpop.f32.mrf.mxu1 }
 0x1ee   : > { %v719_v59 = vadd.f32 %v712_v1, %v598_v58 }
 0x1ef   : > { %v1309_v55 = vpop.f32.mrf.mxu1 }
 0x1f0   : > { %v850_v62 = vadd.f32 %v843_v51, %v719_v59 }
 0x1f1   : > { %v715_v56 = vpop.f32.mrf.mxu1 }
 0x1f2   : > { %v720_v61 = vadd.f32 %v715_v56, %v601_v60 }
 0x1f3   : > { %v1310_v57 = vpop.f32.mrf.mxu1 }
 0x1f4   : > { %v851_v5 = vadd.f32 %v846_v53, %v720_v61 }
 0x20d   : > { %v960_v63 = vpop.f32.mrf.mxu1 }
 0x20e   : > { %v967_v2 = vadd.f32 %v960_v63, %v850_v62 }
 0x20f   : > { %v1349_v3 = vpop.f32.mrf.mxu1 }
 0x210   : > { %v976_v4 = vadd.f32 %v1170_v0, %v967_v2 }
 0x211   : > { %v963_v6 = vpop.f32.mrf.mxu1 }
 0x212   : > { %v980_v7 = vadd.f32 %v976_v4, %v1508_v9  ;;  %v968_v8 = vadd.f32 %v963_v6, %v851_v5 }
 0x213   : > { %v1350_v11 = vpop.f32.mrf.mxu1 }
 0x214   : > { %v982_v12 = vmax.f32 %v980_v7, 0.0  ;;  %v977_v13 = vadd.f32 %v1170_v0, %v968_v8 }
 0x216   : > { %984 = vst [vmem:[%s224_s13] sm:$0xff] %v982_v12  ;;  %v981_v14 = vadd.f32 %v977_v13, %v1510_v10 }
 0x218   : > { %v983_v15 = vmax.f32 %v981_v14, 0.0 }
 0x21a   : > { %985 = vst [vmem:[%s224_s13 + $0x8] sm:$0xff] %v983_v15 }
 0x21b PF: > { %s15_s18 = sadd.s32 1, %s1421_s18  }
 0x21c   : > { %p12_p4 = scmp.ge.s32.totalorder %s15_s18, 4  }
 0x21e   :  { %14 = sbr.rel (!%p12_p4) target bundleno = 1 (0x1), region = 74 }

</bundles_post_ra>
